<compile_context>
chip_gen: v6e
topology: v6e:2x2x1
jax: 0.10.0
libtpu: 0.0.40
codegen_flags: <defaults>
</compile_context>

<pallas_src>
import numpy as np

import jax
import jax.numpy as jnp
from jax.experimental import pallas as pl
from jax.experimental.pallas import tpu as pltpu


# -----------------------------------------------------------------------------
# Primary path: zero-copy identity (output aliases the input buffer, no-op body).
# -----------------------------------------------------------------------------
def _identity_alias_kernel(x_hbm_ref, o_hbm_ref):
    # The output buffer *is* the input buffer (input_output_aliases below),
    # so the result is already in place: no DMA, no VMEM staging, no compute.
    del x_hbm_ref, o_hbm_ref


_ZERO_COST = pl.CostEstimate(flops=0, transcendentals=0, bytes_accessed=0)


def _identity_zero_copy(x: jax.Array) -> jax.Array:
    return pl.pallas_call(
        _identity_alias_kernel,
        out_shape=jax.ShapeDtypeStruct(x.shape, x.dtype),
        in_specs=[pl.BlockSpec(memory_space=pl.ANY)],   # raw HBM ref, no auto-DMA
        out_specs=pl.BlockSpec(memory_space=pl.ANY),    # raw HBM ref, no auto-DMA
        input_output_aliases={0: 0},                    # output buffer == input buffer
        cost_estimate=_ZERO_COST,                       # don't perturb XLA scheduling
        compiler_params=pltpu.CompilerParams(
            has_side_effects=True,                      # never DCE the empty body
        ),
    )(x)


# -----------------------------------------------------------------------------
# Fallback / non-aliasing path: single HBM->HBM DMA producing an independent
# output buffer (pure bandwidth work, no VMEM round-trip, no grid overhead).
# -----------------------------------------------------------------------------
def _identity_dma_kernel(x_hbm_ref, o_hbm_ref, sem):
    copy = pltpu.make_async_copy(x_hbm_ref, o_hbm_ref, sem)
    copy.start()
    copy.wait()


def _identity_dma_copy(x: jax.Array) -> jax.Array:
    nbytes = x.size * x.dtype.itemsize
    return pl.pallas_call(
        _identity_dma_kernel,
        out_shape=jax.ShapeDtypeStruct(x.shape, x.dtype),
        in_specs=[pl.BlockSpec(memory_space=pl.ANY)],   # stay in HBM
        out_specs=pl.BlockSpec(memory_space=pl.ANY),    # stay in HBM
        scratch_shapes=[pltpu.SemaphoreType.DMA(())],   # one DMA-completion sem
        cost_estimate=pl.CostEstimate(
            flops=0, transcendentals=0, bytes_accessed=2 * nbytes),
    )(x)


def your_model_forward(x: jax.Array, *, zero_copy: bool = True) -> jax.Array:
    """Pallas implementation of Your_model.forward (identity).

    zero_copy=True  -> output aliases the input buffer (wrap the call in
                       jax.jit(..., donate_argnums=0) for a genuine 0-byte op).
    zero_copy=False -> single HBM->HBM DMA; output is an independent buffer.
    The choice is a static Python flag, resolved at trace/compile time.
    """
    if zero_copy:
        return _identity_zero_copy(x)
    return _identity_dma_copy(x)


if __name__ == "__main__":
    key = jax.random.PRNGKey(0)
    # Small NCHW-style input consistent with a generic image module.
    x = jax.random.normal(key, (2, 4, 16, 16), dtype=jnp.float32)
    x_host = np.asarray(x)  # host-side reference copy (survives donation)

    # --- Primary path: donated, aliased, truly zero-copy identity. ---------
    fwd_zero_copy = jax.jit(your_model_forward, donate_argnums=0)
    y = fwd_zero_copy(x)                 # x's buffer is donated to y
    jax.block_until_ready(y)
    assert y.shape == x_host.shape and y.dtype == x_host.dtype
    assert np.array_equal(np.asarray(y), x_host)

    # --- Fallback path: single HBM->HBM DMA into a fresh buffer. -----------
    x2 = jnp.asarray(x_host)
    y2 = your_model_forward(x2, zero_copy=False)
    jax.block_until_ready(y2)
    assert y2.shape == x_host.shape and y2.dtype == x_host.dtype
    assert np.array_equal(np.asarray(y2), x_host)

    print("KERNEL_OK")
</pallas_src>

<mosaic_0001>
module attributes {stable_mosaic.version = 11 : i64} {
  func.func @_identity_alias_kernel(%arg0: memref<2x4x16x16xf32, #tpu.memory_space<any>>, %arg1: memref<2x4x16x16xf32, #tpu.memory_space<any>>) attributes {dimension_semantics = [], scalar_prefetch = 0 : i64, scratch_operands = 0 : i64, tpu.core_type = #tpu.core_type<tc>} {
    return
  }
}

</mosaic_0001>

<bundles_post_ra>
// kernel: your_model_forward.1
= control target key start
LH: loop header
LB: loop body
LE: loop exit
PB: predicated region body
PF: predicated region fallthrough
CT: control target
= control target key end

     0   :  { %s16_s0 = inlined_call_operand.hbm [shape: f32[2,4,16,16], index: 0, kind: input, shape index: {}, may-alias: {0,1}]   ;;  %s17_s1 = inlined_call_operand.hbm [shape: f32[2,4,16,16], index: 1, kind: output, shape index: {}, may-alias: {0,1}]  }

</bundles_post_ra>
